<compile_context>
chip_gen: v6e
topology: v6e:2x2x1
jax: 0.10.0
libtpu: 0.0.40
codegen_flags: <defaults>
</compile_context>

<pallas_src>
import math

import jax
import jax.numpy as jnp
from jax.experimental import pallas as pl
from jax.experimental.pallas import tpu as pltpu


_BIG_NEG = -1e30  # finite mask fill: avoids inf-inf / 0/0 NaN on fully masked rows


def _attn_core_kernel(q_ref, k_ref, v_ref, key_mask_ref, attn_mask_ref,
                      ctx_ref, attn_ref):
    """Per-(batch, q-tile) attention core, batched over heads.

    Block shapes:
      q_ref         (1, n_head, bq, head_dim)   compute dtype (bf16)
      k_ref, v_ref  (1, n_head, Sk, head_dim)   compute dtype (bf16)
      key_mask_ref  (1, 1, Sk)                  f32, 1 = attend
      attn_mask_ref (bq, Sk)                    f32, 1 = keep
      ctx_ref       (1, n_head, bq, head_dim)   f32
      attn_ref      (1, n_head, bq, Sk)         f32 (Sk on the lane axis)
    """
    q = q_ref[0]                                   # (n_head, bq, head_dim)
    k = k_ref[0]                                   # (n_head, Sk, head_dim)
    v = v_ref[0]                                   # (n_head, Sk, head_dim)

    # Scores for all heads in one batched MXU contraction, f32 accumulation.
    s = jnp.einsum("nqh,nkh->nqk", q, k,
                   preferred_element_type=jnp.float32)        # (n_head, bq, Sk)

    # Single additive mask bias, computed once and shared across all heads.
    # Masks are expected to be exact 0/1 floats.
    keep = key_mask_ref[0] * attn_mask_ref[...]               # (1,Sk)*(bq,Sk)->(bq,Sk)
    bias = jnp.where(keep != 0.0, 0.0, _BIG_NEG).astype(jnp.float32)
    s = s + bias[None, :, :]

    # Softmax over the key axis (f32 math); reciprocal on the EUP slot.
    m = jnp.max(s, axis=-1, keepdims=True)
    e = jnp.exp(s - m)
    p = e * pl.reciprocal(jnp.sum(e, axis=-1, keepdims=True), approx=True)

    attn_ref[0] = p.astype(attn_ref.dtype)

    # Attention-weighted value reduction, batched over heads (bf16 operands).
    ctx = jnp.einsum("nqk,nkh->nqh", p.astype(v.dtype), v,
                     preferred_element_type=jnp.float32)      # (n_head, bq, head_dim)
    ctx_ref[0] = ctx.astype(ctx_ref.dtype)


def multi_head_attention(query, key, value, params, key_mask=None, attn_mask=None,
                         n_head=4, block_q=256, compute_dtype=jnp.bfloat16,
                         attn_dtype=jnp.float32):
    """Pallas-backed MultiHeadAttention forward.

    Returns (output [B, Sq, D], attn_weights [B, Sq, Sk, n_head]) — same as PyTorch.
    """
    B, Sq, D = query.shape
    Sk = key.shape[1]
    assert key.shape == value.shape
    assert D % n_head == 0
    head_dim = D // n_head
    scaling = head_dim ** (-0.5)

    if key_mask is None:
        key_mask = jnp.ones((B, Sk), dtype=jnp.float32)
    if attn_mask is None:
        attn_mask = jnp.ones((Sq, Sk), dtype=jnp.float32)
    key_mask3 = key_mask.astype(jnp.float32).reshape(B, 1, Sk)
    attn_mask = attn_mask.astype(jnp.float32)

    # --- Projections in XLA (one big MXU-friendly matmul each); scaling folded
    #     into the q projection so the kernel never multiplies by it. ---------
    q = query @ (params["wq"].T * scaling) + params["bq"] * scaling
    k = key @ params["wk"].T + params["bk"]
    v = value @ params["wv"].T + params["bv"]

    # Split heads and cast matmul operands to the compute dtype (bf16-native MXU).
    def split_heads(x, S):
        return (x.reshape(B, S, n_head, head_dim)
                 .transpose(0, 2, 1, 3)
                 .astype(compute_dtype))
    qh = split_heads(q, Sq)     # (B, n_head, Sq, head_dim)
    kh = split_heads(k, Sk)     # (B, n_head, Sk, head_dim)
    vh = split_heads(v, Sk)     # (B, n_head, Sk, head_dim)

    # q-tile size: full sequence for small Sq, otherwise block_q rows per step.
    bq = min(block_q, Sq)
    if Sq % bq != 0:
        bq = Sq  # TODO(synk): pad Sq to a multiple of block_q for ragged tiling.
    # TODO(synk): for very long Sk add a trailing "arbitrary" flash-style Sk axis.

    ctx_h, attn_nqk = pl.pallas_call(
        _attn_core_kernel,
        out_shape=(
            jax.ShapeDtypeStruct((B, n_head, Sq, head_dim), jnp.float32),
            jax.ShapeDtypeStruct((B, n_head, Sq, Sk), attn_dtype),
        ),
        grid_spec=pltpu.PrefetchScalarGridSpec(
            num_scalar_prefetch=0,
            grid=(B, Sq // bq),
            in_specs=[
                pl.BlockSpec((1, n_head, bq, head_dim), lambda b, i: (b, 0, i, 0)),
                pl.BlockSpec((1, n_head, Sk, head_dim), lambda b, i: (b, 0, 0, 0)),
                pl.BlockSpec((1, n_head, Sk, head_dim), lambda b, i: (b, 0, 0, 0)),
                pl.BlockSpec((1, 1, Sk), lambda b, i: (b, 0, 0)),
                pl.BlockSpec((bq, Sk), lambda b, i: (i, 0)),
            ],
            out_specs=[
                pl.BlockSpec((1, n_head, bq, head_dim), lambda b, i: (b, 0, i, 0)),
                pl.BlockSpec((1, n_head, bq, Sk), lambda b, i: (b, 0, i, 0)),
            ],
        ),
        compiler_params=pltpu.CompilerParams(
            dimension_semantics=("parallel", "parallel")),
    )(qh, kh, vh, key_mask3, attn_mask)

    # Merge heads + output projection in XLA.
    ctx = ctx_h.transpose(0, 2, 1, 3).reshape(B, Sq, D)
    out = ctx @ params["wo"].T + params["bo"]

    # Kernel stores attention as (B, n_head, Sq, Sk); PyTorch returns 'bqkn'.
    attn_bqkn = jnp.transpose(attn_nqk, (0, 2, 3, 1))
    return out, attn_bqkn


def init_params(key, d_model):
    """Deterministic parameter init matching the module shapes.

    Weights: xavier_uniform over (d_model, d_model); biases: uniform(-1/sqrt(d), 1/sqrt(d)).
    """
    ks = jax.random.split(key, 8)
    bound_w = math.sqrt(6.0 / (d_model + d_model))
    bound_b = 1.0 / math.sqrt(d_model)
    uw = lambda k: jax.random.uniform(k, (d_model, d_model), jnp.float32,
                                      -bound_w, bound_w)
    ub = lambda k: jax.random.uniform(k, (d_model,), jnp.float32, -bound_b, bound_b)
    return {
        "wq": uw(ks[0]), "bq": ub(ks[1]),
        "wk": uw(ks[2]), "bk": ub(ks[3]),
        "wv": uw(ks[4]), "bv": ub(ks[5]),
        "wo": uw(ks[6]), "bo": ub(ks[7]),
    }


def _reference_mha(query, key, value, params, key_mask, attn_mask, n_head,
                   compute_dtype=jnp.bfloat16):
    """Pure-JAX reference mirroring the PyTorch forward (and the kernel's
    bf16-operand / f32-accumulate numerics) for self-checking."""
    B, Sq, D = query.shape
    Sk = key.shape[1]
    hd = D // n_head
    scaling = hd ** (-0.5)
    q = (query @ params["wq"].T + params["bq"]) * scaling
    k = key @ params["wk"].T + params["bk"]
    v = value @ params["wv"].T + params["bv"]
    q = q.reshape(B, Sq, n_head, hd).astype(compute_dtype)
    k = k.reshape(B, Sk, n_head, hd).astype(compute_dtype)
    v = v.reshape(B, Sk, n_head, hd).astype(compute_dtype)
    s = jnp.einsum("bqnh,bknh->bqkn", q, k, preferred_element_type=jnp.float32)
    keep = key_mask[:, None, :, None] * attn_mask[None, :, :, None]
    s = jnp.where(keep != 0.0, s, _BIG_NEG)
    p = jax.nn.softmax(s, axis=2)
    ctx = jnp.einsum("bqkn,bknh->bqnh", p.astype(compute_dtype), v,
                     preferred_element_type=jnp.float32).reshape(B, Sq, D)
    out = ctx @ params["wo"].T + params["bo"]
    return out, p


if __name__ == "__main__":
    B, S, D, n_head = 2, 8, 32, 4

    root = jax.random.PRNGKey(0)
    kq, kk, kv, kp = jax.random.split(root, 4)
    query = jax.random.normal(kq, (B, S, D), jnp.float32)
    key = jax.random.normal(kk, (B, S, D), jnp.float32)
    value = jax.random.normal(kv, (B, S, D), jnp.float32)
    params = init_params(kp, D)

    # key_mask: 1 = attend; mask out the last two keys of batch 1.
    key_mask = jnp.ones((B, S), jnp.float32).at[1, -2:].set(0.0)
    # attn_mask: causal lower-triangular (1 = keep).
    attn_mask = jnp.tril(jnp.ones((S, S), jnp.float32))

    out, attn = multi_head_attention(query, key, value, params,
                                     key_mask=key_mask, attn_mask=attn_mask,
                                     n_head=n_head)
    out = jax.block_until_ready(out)
    attn = jax.block_until_ready(attn)

    ref_out, ref_attn = _reference_mha(query, key, value, params,
                                       key_mask, attn_mask, n_head)
    assert out.shape == (B, S, D) and attn.shape == (B, S, S, n_head)
    # Tolerances sized for bf16 MXU operands + approx reciprocal (reference
    # mirrors the bf16 casts, so the remaining delta is small).
    assert jnp.allclose(out, ref_out, atol=2e-2, rtol=2e-2)
    assert jnp.allclose(attn, ref_attn, atol=2e-2, rtol=2e-2)
    # Each un-masked softmax row must sum to 1.
    assert jnp.allclose(attn.sum(axis=2), jnp.ones((B, S, n_head)), atol=1e-2)

    print("KERNEL_OK")
</pallas_src>

<mosaic_0001>
module attributes {stable_mosaic.version = 11 : i64} {
  func.func @_attn_core_kernel(%arg0: i32, %arg1: i32, %arg2: memref<1x4x8x8xbf16, #tpu.memory_space<vmem>>, %arg3: memref<1x4x8x8xbf16, #tpu.memory_space<vmem>>, %arg4: memref<1x4x8x8xbf16, #tpu.memory_space<vmem>>, %arg5: memref<1x1x8xf32, #tpu.memory_space<vmem>>, %arg6: memref<8x8xf32, #tpu.memory_space<vmem>>, %arg7: memref<1x4x8x8xf32, #tpu.memory_space<vmem>>, %arg8: memref<1x4x8x8xf32, #tpu.memory_space<vmem>>) attributes {dimension_semantics = [#tpu.dimension_semantics<parallel>, #tpu.dimension_semantics<parallel>], iteration_bounds = array<i64: 2, 1>, scalar_prefetch = 0 : i64, scratch_operands = 0 : i64, tpu.core_type = #tpu.core_type<tc>, window_params = [{transform_indices = @transform_0, window_bounds = array<i64: 1, 4, 8, 8>}, {transform_indices = @transform_1, window_bounds = array<i64: 1, 4, 8, 8>}, {transform_indices = @transform_2, window_bounds = array<i64: 1, 4, 8, 8>}, {transform_indices = @transform_3, window_bounds = array<i64: 1, 1, 8>}, {transform_indices = @transform_4, window_bounds = array<i64: 8, 8>}, {transform_indices = @transform_5, window_bounds = array<i64: 1, 4, 8, 8>}, {transform_indices = @transform_6, window_bounds = array<i64: 1, 4, 8, 8>}]} {
    %c0 = arith.constant 0 : index
    %c0_0 = arith.constant 0 : index
    %c0_1 = arith.constant 0 : index
    %c0_2 = arith.constant 0 : index
    %0 = vector.load %arg2[%c0, %c0_0, %c0_1, %c0_2] : memref<1x4x8x8xbf16, #tpu.memory_space<vmem>>, vector<1x4x8x8xbf16>
    %1 = vector.shape_cast %0 : vector<1x4x8x8xbf16> to vector<4x8x8xbf16>
    %c0_3 = arith.constant 0 : index
    %c0_4 = arith.constant 0 : index
    %c0_5 = arith.constant 0 : index
    %c0_6 = arith.constant 0 : index
    %2 = vector.load %arg3[%c0_3, %c0_4, %c0_5, %c0_6] : memref<1x4x8x8xbf16, #tpu.memory_space<vmem>>, vector<1x4x8x8xbf16>
    %3 = vector.shape_cast %2 : vector<1x4x8x8xbf16> to vector<4x8x8xbf16>
    %c0_7 = arith.constant 0 : index
    %c0_8 = arith.constant 0 : index
    %c0_9 = arith.constant 0 : index
    %c0_10 = arith.constant 0 : index
    %4 = vector.load %arg4[%c0_7, %c0_8, %c0_9, %c0_10] : memref<1x4x8x8xbf16, #tpu.memory_space<vmem>>, vector<1x4x8x8xbf16>
    %5 = vector.shape_cast %4 : vector<1x4x8x8xbf16> to vector<4x8x8xbf16>
    "tpu.trace_start"() <{level = 10 : i32, message = "nqh,nkh->nqk"}> : () -> ()
    %cst = arith.constant dense<0.000000e+00> : vector<4x8x8xf32>
    %6 = tpu.matmul %1, %3, %cst {dimension_numbers = #tpu.dot_dimension_numbers<[2], [2], [1], [1], [0, 0, 0, 1, 1, 1], [0], [0]>} : vector<4x8x8xbf16>, vector<4x8x8xbf16>, vector<4x8x8xf32> -> vector<4x8x8xf32>
    "tpu.trace_stop"() : () -> ()
    %c0_11 = arith.constant 0 : index
    %c0_12 = arith.constant 0 : index
    %c0_13 = arith.constant 0 : index
    %7 = vector.load %arg5[%c0_11, %c0_12, %c0_13] : memref<1x1x8xf32, #tpu.memory_space<vmem>>, vector<1x1x8xf32>
    %8 = vector.shape_cast %7 : vector<1x1x8xf32> to vector<1x8xf32>
    %c0_14 = arith.constant 0 : index
    %c0_15 = arith.constant 0 : index
    %9 = vector.load %arg6[%c0_14, %c0_15] : memref<8x8xf32, #tpu.memory_space<vmem>>, vector<8x8xf32>
    %10 = vector.broadcast %8 : vector<1x8xf32> to vector<8x8xf32>
    %11 = arith.mulf %10, %9 : vector<8x8xf32>
    %cst_16 = arith.constant 0.000000e+00 : f32
    %12 = vector.broadcast %cst_16 : f32 to vector<8x8xf32>
    %13 = arith.cmpf one, %11, %12 : vector<8x8xf32>
    %cst_17 = arith.constant 0.000000e+00 : f32
    %cst_18 = arith.constant -1.000000e+30 : f32
    %14 = vector.broadcast %cst_17 : f32 to vector<8x8xf32>
    %15 = vector.broadcast %cst_18 : f32 to vector<8x8xf32>
    %16 = arith.select %13, %14, %15 : vector<8x8xi1>, vector<8x8xf32>
    %17 = vector.shape_cast %16 : vector<8x8xf32> to vector<1x8x8xf32>
    %18 = vector.broadcast %17 : vector<1x8x8xf32> to vector<4x8x8xf32>
    %19 = arith.addf %6, %18 : vector<4x8x8xf32>
    %cst_19 = arith.constant dense<0xFF800000> : vector<4x8xf32>
    %20 = vector.multi_reduction <maximumf>, %19, %cst_19 [2] : vector<4x8x8xf32> to vector<4x8xf32>
    %21 = vector.shape_cast %20 : vector<4x8xf32> to vector<4x8x1xf32>
    %22 = vector.broadcast %21 : vector<4x8x1xf32> to vector<4x8x8xf32>
    %23 = arith.subf %19, %22 : vector<4x8x8xf32>
    %24 = math.exp %23 : vector<4x8x8xf32>
    %cst_20 = arith.constant dense<0.000000e+00> : vector<4x8xf32>
    %25 = vector.multi_reduction <add>, %24, %cst_20 [2] : vector<4x8x8xf32> to vector<4x8xf32>
    %26 = vector.shape_cast %25 : vector<4x8xf32> to vector<4x8x1xf32>
    %27 = tpu.reciprocal %26 {approx = true} : vector<4x8x1xf32> -> vector<4x8x1xf32>
    %28 = vector.broadcast %27 : vector<4x8x1xf32> to vector<4x8x8xf32>
    %29 = arith.mulf %24, %28 : vector<4x8x8xf32>
    %c0_21 = arith.constant 0 : index
    %c0_22 = arith.constant 0 : index
    %c0_23 = arith.constant 0 : index
    %c0_24 = arith.constant 0 : index
    %30 = vector.load %arg8[%c0_21, %c0_22, %c0_23, %c0_24] : memref<1x4x8x8xf32, #tpu.memory_space<vmem>>, vector<1x4x8x8xf32>
    %31 = vector.shape_cast %30 : vector<1x4x8x8xf32> to vector<4x8x8xf32>
    %32 = vector.shape_cast %29 : vector<4x8x8xf32> to vector<1x4x8x8xf32>
    tpu.vector_store %arg8[%c0_21, %c0_22, %c0_23, %c0_24], %32 {strides = array<i32>} : memref<1x4x8x8xf32, #tpu.memory_space<vmem>>, vector<1x4x8x8xf32>,
    %33 = arith.truncf %29 : vector<4x8x8xf32> to vector<4x8x8xbf16>
    "tpu.trace_start"() <{level = 10 : i32, message = "nqk,nkh->nqh"}> : () -> ()
    %cst_25 = arith.constant dense<0.000000e+00> : vector<4x8x8xf32>
    %34 = tpu.matmul %33, %5, %cst_25 {dimension_numbers = #tpu.dot_dimension_numbers<[2], [1], [1], [2], [0, 0, 0, 1, 1, 2], [0], [0]>} : vector<4x8x8xbf16>, vector<4x8x8xbf16>, vector<4x8x8xf32> -> vector<4x8x8xf32>
    "tpu.trace_stop"() : () -> ()
    %c0_26 = arith.constant 0 : index
    %c0_27 = arith.constant 0 : index
    %c0_28 = arith.constant 0 : index
    %c0_29 = arith.constant 0 : index
    %35 = vector.load %arg7[%c0_26, %c0_27, %c0_28, %c0_29] : memref<1x4x8x8xf32, #tpu.memory_space<vmem>>, vector<1x4x8x8xf32>
    %36 = vector.shape_cast %35 : vector<1x4x8x8xf32> to vector<4x8x8xf32>
    %37 = vector.shape_cast %34 : vector<4x8x8xf32> to vector<1x4x8x8xf32>
    tpu.vector_store %arg7[%c0_26, %c0_27, %c0_28, %c0_29], %37 {strides = array<i32>} : memref<1x4x8x8xf32, #tpu.memory_space<vmem>>, vector<1x4x8x8xf32>,
    return
  }
  func.func @transform_0(%arg0: i32, %arg1: i32) -> (i32, i32, i32, i32) {
    %c0_i32 = arith.constant 0 : i32
    %c0_i32_0 = arith.constant 0 : i32
    %c0_i32_1 = arith.constant 0 : i32
    return %arg0, %c0_i32, %arg1, %c0_i32_0 : i32, i32, i32, i32
  }
  func.func @transform_1(%arg0: i32, %arg1: i32) -> (i32, i32, i32, i32) {
    %c0_i32 = arith.constant 0 : i32
    %c0_i32_0 = arith.constant 0 : i32
    %c0_i32_1 = arith.constant 0 : i32
    %c0_i32_2 = arith.constant 0 : i32
    return %arg0, %c0_i32, %c0_i32_0, %c0_i32_1 : i32, i32, i32, i32
  }
  func.func @transform_2(%arg0: i32, %arg1: i32) -> (i32, i32, i32, i32) {
    %c0_i32 = arith.constant 0 : i32
    %c0_i32_0 = arith.constant 0 : i32
    %c0_i32_1 = arith.constant 0 : i32
    %c0_i32_2 = arith.constant 0 : i32
    return %arg0, %c0_i32, %c0_i32_0, %c0_i32_1 : i32, i32, i32, i32
  }
  func.func @transform_3(%arg0: i32, %arg1: i32) -> (i32, i32, i32) {
    %c0_i32 = arith.constant 0 : i32
    %c0_i32_0 = arith.constant 0 : i32
    %c0_i32_1 = arith.constant 0 : i32
    return %arg0, %c0_i32, %c0_i32_0 : i32, i32, i32
  }
  func.func @transform_4(%arg0: i32, %arg1: i32) -> (i32, i32) {
    %c0_i32 = arith.constant 0 : i32
    %c0_i32_0 = arith.constant 0 : i32
    return %arg1, %c0_i32 : i32, i32
  }
  func.func @transform_5(%arg0: i32, %arg1: i32) -> (i32, i32, i32, i32) {
    %c0_i32 = arith.constant 0 : i32
    %c0_i32_0 = arith.constant 0 : i32
    %c0_i32_1 = arith.constant 0 : i32
    return %arg0, %c0_i32, %arg1, %c0_i32_0 : i32, i32, i32, i32
  }
  func.func @transform_6(%arg0: i32, %arg1: i32) -> (i32, i32, i32, i32) {
    %c0_i32 = arith.constant 0 : i32
    %c0_i32_0 = arith.constant 0 : i32
    %c0_i32_1 = arith.constant 0 : i32
    return %arg0, %c0_i32, %arg1, %c0_i32_0 : i32, i32, i32, i32
  }
}

</mosaic_0001>

<bundles_post_ra>
// kernel: tpu_custom_call.1
= control target key start
LH: loop header
LB: loop body
LE: loop exit
PB: predicated region body
PF: predicated region fallthrough
CT: control target
= control target key end

     0   :  { %s1927_s0 = inlined_call_operand.hbm [shape: bf16[2,4,8,8], index: 0, kind: input, shape index: {}]   ;;  %s1928_s1 = inlined_call_operand.hbm [shape: bf16[2,4,8,8], index: 1, kind: input, shape index: {}]   ;;  %s1929_s2 = inlined_call_operand.hbm [shape: bf16[2,4,8,8], index: 2, kind: input, shape index: {}]   ;;  %s1930_s3 = inlined_call_operand.vmem [shape: f32[2,1,8], index: 3, kind: input, shape index: {}]   ;;  %s1931_s4 = inlined_call_operand.hbm [shape: f32[8,8], index: 4, kind: input, shape index: {}]   ;;  %s1932_s5 = inlined_call_operand.hbm [shape: f32[2,4,8,8], index: 5, kind: output, shape index: {0}]   ;;  %s1933_s6 = inlined_call_operand.hbm [shape: f32[2,4,8,8], index: 6, kind: output, shape index: {1}]  }
   0x1   :  { %1945 = sst [smem:[#allocation22_spill]] %s1927_s0 }
   0x2   :  { %1946 = sst [smem:[#allocation23_spill]] %s1928_s1 }
   0x3   :  { %12 = vsyncpa [#allocation3], 0 }
   0x4   :  { %14 = vsyncpa [#allocation3 + $0x1], 0 }
   0x5   :  { %15 = vsyncpa [#allocation6], 0 }
   0x6   :  { %17 = vsyncpa [#allocation6 + $0x1], 0 }
   0x7   :  { %18 = vsyncpa [#allocation9], 0 }
   0x8   :  { %19 = vsyncpa [#allocation4], 0 }
   0x9   :  { %21 = vsyncpa [#allocation4 + $0x1], 0 }
   0xa   :  { %22 = vsyncpa [#allocation12], 0 }
   0xb   :  { %24 = vsyncpa [#allocation12 + $0x1], 0  ;;  %s1577_s21 = smov 0   ;;  %s1579_s22 = smov 0  }
   0xc   :  { %s1581_s23 = smov 0   ;;  %s1583_s24 = smov 0  }
   0xd   :  { %s1585_s25 = smov 0   ;;  %s1587_s26 = smov 0  }
   0xe LB: > { %1947 = sst [smem:[#allocation18_spill]] %s1523_s25  ;;  %s42_s27 = sadd.s32 1, %s1523_s25  ;;  %s1527_s26 = sphi %s1587_s26, %s30_s26   ;;  %s1523_s25 = sphi %s1585_s25, %s1970_s25   ;;  %s1519_s24 = sphi %s1583_s24, %s1969_s24   ;;  %s1515_s23 = sphi %s1581_s23, %s1973_s23   ;;  %s1511_s22 = sphi %s1579_s22, %s1972_s22   ;;  %s1507_s21 = sphi %s1577_s21, %s1971_s21  }
   0xf   : > { %1948 = sst [smem:[#allocation19_spill]] %s1527_s26  ;;  %s51_s28 = sadd.s32 1, %s1515_s23 }
  0x10   : > { %p44_p0 = scmp.ge.s32.totalorder %s42_s27, 2  ;;  %p58_p1 = scmp.ne.s32.totalorder %s1515_s23, %s1511_s22 }
  0x11   : > { %p59_p2 = scmp.eq.s32.totalorder %s1527_s26, 0  ;;  %p1224_p5 = scmp.lt.s32.totalorder %s1527_s26, 2 }
  0x12   : > { %s1975_s27 = smov (%p44_p0, %s42_s27), 0  ;;  %s1938_s30 = sand.u32 1, %s1515_s23  }
  0x13   : > { %1949 = sst [smem:[#allocation20_spill]] %s1975_s27  ;;  %p60_p4 = por %p59_p2, %p58_p1 }
  0x14   : > { %s46_s29 = ssub.s32 %s1523_s25, %s1975_s27  ;;  %s1624_s7 = sshll.u32 %s1938_s30, 4 }
  0x15   : > { %p49_p6 = scmp.eq.s32.totalorder %s46_s29, 0  ;;  %s1627_s8 = sshll.u32 %s1523_s25, 8 }
  0x16   : > { %p1629_p7 = pnand %p1224_p5, %p60_p4  ;;  %s283_s11 = sand.u32 1, %s1527_s26  }
  0x17   : > { %s1634_s10 = scalar_select %p49_p6, %s1515_s23, %s51_s28  }
  0x18   : > { %s1952_s1 = sld [smem:[#allocation23_spill]]  ;;  %s287_s15 = scalar_lea.vmem [#allocation5], %s1624_s7 }
  0x19   : > { %1951 = sst [smem:[#allocation21_spill]] %s1634_s10  ;;  %s294_s16 = sshll.u32 %s287_s15, 4  ;;  %s295_s16 = int_to_ptr.vmem [resolvable:$true] %s294_s16 }
  0x1a   : > { %s1642_s17 = scalar_lea.sflag [#allocation6], %s283_s11  ;;  %p1944_p8 = pneg %p1629_p7 }
  0x1b   : > { %s1312_s18 = scalar_lea.vmem %s295_s16, 256  ;;  %s1529_s19 = smov [#allocation5]  }
  0x1c   : > { %p1313_p9 = scmp.ne.s32.totalorder %s295_s16, %s1312_s18  ;;  %s1317_s20 = sshll.u32 %s1529_s19, 4  ;;  %s1318_s20 = int_to_ptr.vmem [resolvable:$false] %s1317_s20 }
  0x1d   : > { %s1319_s28 = scalar_lea.vmem %s1318_s20, 512  ;;  %p1320_p12 = scmp.lt.s32.totalorder %s295_s16, %s1318_s20 }
  0x1e   : > { %s293_s14 = scalar_lea.hbm %s1952_s1, %s1627_s8  ;;  %p1315_p10 = pnand %p1313_p9, %p1944_p8 }
  0x1f   : > { %p1321_p13 = scmp.lt.s32.totalorder %s1319_s28, %s1312_s18 }
  0x20   : > { %p1316_p11 = pneg %p1315_p10 }
  0x21   : > { %p1322_p0 = por %p1321_p13, %p1320_p12 }
  0x23   : > { %p1323_p2 = pnand %p1322_p0, %p1316_p11 }
  0x25   : > { %1326 = shalt.err (!%p1323_p2)
}
  0x26   : > { %s1934_s29 = smov 64   ;;  %s1936_s11 = smov 4  }
  0x27   : > { %1212 = dma.hbm_to_vmem [thread:$0]  (!%p1629_p7), %s293_s14, 256, %s295_s16, %s1642_s17, %s1934_s29, %s1934_s29, %s1936_s11  }
  0x28   : > { %s1656_s12 = sadd.s32 4294967295, %s1527_s26   ;;  %s1082_s13 = sadd.s32 4294967294, %s1527_s26  }
  0x29   : > { %p64_p4 = scmp.ne.s32.totalorder %s1511_s22, %s1507_s21  ;;  %p1943_p5 = scmp.eq.s32.totalorder %s1656_s12, 0 }
  0x2a   : > { %p194_p6 = scmp.eq.s32.totalorder %s1656_s12, 1  ;;  %p200_p9 = scmp.eq.s32.totalorder %s1082_s13, 1 }
  0x2b   : > { %p1083_p10 = scmp.ge.s32.totalorder %s1527_s26, 1  ;;  %p1666_p11 = por %p1943_p5, %p64_p4 }
  0x2c   : > { %p1673_p12 = por %p194_p6, %p58_p1  ;;  %p1677_p13 = por %p200_p9, %p64_p4 }
  0x2d   : > { %p235_p0 = scmp.lt.s32.totalorder %s1527_s26, 3  ;;  %s1532_s19 = smov [#allocation8]  }
  0x2e   : > { %s1955_s16 = scalar_select %p1677_p13, 1, 0 }
  0x2f   : > { %p1682_p2 = pnand %p1083_p10, %p235_p0  ;;  %s250_s20 = sshll.u32 %s1532_s19, 4  ;;  %s1686_s20 = int_to_ptr.vmem [resolvable:$true] %s250_s20 }
  0x30   : > { %s1957_s0 = sld [smem:[#allocation22_spill]]  ;;  %s265_s11 = scalar_lea.vmem [#allocation2], %s1624_s7 }
  0x31   : > { %p1202_p1 = pneg %p1682_p2  ;;  %s273_s30 = sshll.u32 %s265_s11, 4  ;;  %s274_s30 = int_to_ptr.vmem [resolvable:$true] %s273_s30 }
  0x32   : > { %s1959_s27 = sand.u32 1, %s1515_s23   ;;  %s1340_s10 = scalar_lea.vmem %s274_s30, 256 }
  0x33   : > { %p1697_p4 = pnand %p1202_p1, %p1943_p5  ;;  %s262_s25 = scalar_lea.sflag [#allocation3], %s1959_s27 }
  0x34   : > { %p1341_p6 = scmp.ne.s32.totalorder %s274_s30, %s1340_s10  ;;  %s1533_s19 = smov [#allocation2]  }
  0x35   : > { %s1345_s26 = sshll.u32 %s1533_s19, 4  ;;  %s1346_s26 = int_to_ptr.vmem [resolvable:$false] %s1345_s26 }
  0x36   : > { %s272_s29 = scalar_lea.hbm %s1957_s0, %s1627_s8  ;;  %p1343_p9 = pnand %p1341_p6, %p1944_p8 }
  0x37   : > { %s1347_s28 = scalar_lea.vmem %s1346_s26, 512  ;;  %p1348_p0 = scmp.lt.s32.totalorder %s274_s30, %s1346_s26 }
  0x38   : > { %p1344_p10 = pneg %p1343_p9  ;;  %p1349_p3 = scmp.lt.s32.totalorder %s1347_s28, %s1340_s10 }
  0x3a   : > { %p1350_p13 = por %p1349_p3, %p1348_p0 }
  0x3c   : > { %p1351_p1 = pnand %p1350_p13, %p1344_p10 }
  0x3e   : > { %1354 = shalt.err (!%p1351_p1)
}
  0x3f   : > { %s1960_s11 = smov 4   ;;  %s1961_s13 = smov 64  }
  0x40   : > { %1209 = dma.hbm_to_vmem [thread:$0]  (!%p1629_p7), %s272_s29, 256, %s274_s30, %s262_s25, %s1961_s13, %s1961_s13, %s1960_s11  }
  0x41   : > { %p1357_p6 = pneg %p1697_p4  ;;  %s1366_s27 = scalar_lea.vmem %s1686_s20, 128 }
  0x42   : > { %p1367_p9 = scmp.ne.s32.totalorder %s1686_s20, %s1366_s27  ;;  %p1374_p3 = scmp.lt.s32.totalorder %s1686_s20, %s1686_s20 }
  0x43   : > { %p1375_p13 = scmp.lt.s32.totalorder %s1366_s27, %s1366_s27 }
  0x44   : > { %p1369_p5 = pnand %p1367_p9, %p1357_p6 }
  0x45   : > { %p1376_p10 = por %p1375_p13, %p1374_p3 }
  0x46   : > { %p1370_p8 = pneg %p1369_p5 }
  0x48   : > { %p1377_p0 = pnand %p1376_p10, %p1370_p8 }
  0x4a   : > { %1380 = shalt.err (!%p1377_p0)
}
  0x4b   : > { %1205 = dma.hbm_to_vmem [thread:$0]  (!%p1697_p4), %s1931_s4, 128, %s1686_s20, [#allocation9]  }
  0x4c   : > { %s314_s29 = scalar_lea.hbm %s1929_s2, %s1627_s8  ;;  %s308_s19 = scalar_lea.vmem [#allocation7], %s1624_s7 }
  0x4d   : > { %s315_s28 = sshll.u32 %s308_s19, 4  ;;  %p1962_p5 = pneg %p1629_p7  ;;  %s316_s28 = int_to_ptr.vmem [resolvable:$true] %s315_s28 }
  0x4e   : > { %s1394_s27 = scalar_lea.vmem %s316_s28, 256  ;;  %s1534_s1 = smov [#allocation7]  }
  0x4f   : > { %p1395_p8 = scmp.ne.s32.totalorder %s316_s28, %s1394_s27  ;;  %s1399_s0 = sshll.u32 %s1534_s1, 4  ;;  %s1400_s0 = int_to_ptr.vmem [resolvable:$false] %s1399_s0 }
  0x50   : > { %s1401_s26 = scalar_lea.vmem %s1400_s0, 512  ;;  %p1402_p9 = scmp.lt.s32.totalorder %s316_s28, %s1400_s0 }
  0x51   : > { %p1397_p1 = pnand %p1395_p8, %p1962_p5  ;;  %p1403_p3 = scmp.lt.s32.totalorder %s1401_s26, %s1394_s27 }
  0x53   : > { %p1398_p6 = pneg %p1397_p1  ;;  %p1404_p4 = por %p1403_p3, %p1402_p9 }
  0x55   : > { %p1405_p13 = pnand %p1404_p4, %p1398_p6 }
  0x57   : > { %1408 = shalt.err (!%p1405_p13)
}
  0x58   : > { %1215 = dma.hbm_to_vmem [thread:$0]  (!%p1629_p7), %s314_s29, 256, %s316_s28, %s1642_s17, %s1961_s13, %s1961_s13, %s1960_s11  }
  0x59   : > { %333 = sbr.rel (%p1682_p2) target bundleno = 841 (0x349), region = 40  ;;  %s1740_s7 = sand.u32 (!%p1682_p2), 1, %s1511_s22  }
  0x5a   : > { %s1096_s0 = sshll.u32 (!%p1682_p2), %s1740_s7, 4  ;;  %s336_s8 = scalar_lea.sflag (!%p1682_p2), [#allocation3], %s1740_s7 }
  0x5b   : > { %s1744_s20 = scalar_lea.vmem (!%p1682_p2), [#allocation2], %s1096_s0 }
  0x5e   : > { %1486 = dma.done.wait (%p1666_p11), %s336_s8, 256  }
  0x5f   : > { %1488 = vsyncadd (%p1666_p11), %s336_s8, 4294967040  ;;  %s344_s9 = sand.u32 1, %s1656_s12   ;;  %s348_s18 = scalar_lea.vmem [#allocation5], %s1096_s0 }
  0x60   : > { %s345_s17 = scalar_lea.sflag [#allocation6], %s344_s9 }
  0x61   : > { %1490 = dma.done.wait (%p1666_p11), %s345_s17, 512  }
  0x62   : > { %1492 = vsyncadd (%p1666_p11), %s345_s17, 4294966784  ;;  %s1755_s11 = scalar_lea.vmem [#allocation7], %s1096_s0  ;;  %p1963_p7 = scmp.eq.s32.totalorder %s1656_s12, 0 }
  0x64   : > { %1494 = dma.done.wait (%p1963_p7), [#allocation9], 128   ;;  %p1964_p2 = pmov %p1963_p7 }
  0x65   : > { %v1535_v0 = vmov 0.0   ;;  %vm1536_vm0 = vmmov 0   ;;  %vm435_vm1 = vcmask 64512   ;;  %v416_v1 = vld [vmem:[%s348_s18] sm:$0xf]  ;;  %p408_p11 = scmp.lt.s32.totalorder %s1519_s24, 1 }
  0x66   : > { %1496 = vsyncadd (%p1964_p2), [#allocation9], 4294967168  ;;  %1140 = vmatprep.subr.bf16.mxu0 %v1535_v0  ;;  %1146 = vmatprep.subr.bf16.mxu1 %v1535_v0  ;;  %v417_v2 = vld [vmem:[%s348_s18 + $0x4] sm:$0xf]  ;;  %v440_v3 = vsel %vm435_vm1, %v416_v1, 0  ;;  %vm675_vm3 = vcmask 1043456  }
  0x67   : > { %1142 = vmatprep.mubr.msk.bf16.mxu0 %vm1536_vm0, %v1535_v0  ;;  %1148 = vmatprep.mubr.msk.bf16.mxu1 %vm1536_vm0, %v1535_v0  ;;  %v486_v4 = vsel %vm435_vm1, %v417_v2, 0  ;;  %v418_v5 = vld [vmem:[%s348_s18 + $0x8] sm:$0xf]  ;;  %v419_v6 = vld [vmem:[%s348_s18 + $0xc] sm:$0xf]  ;;  %s409_s12 = scalar_select %p408_p11, %s1519_s24, 1 }
  0x68   : > { %1141 = vmatpush3.bf16.xpose.msra.mxu0 %v440_v3  ;;  %1147 = vmatpush3.bf16.xpose.msra.mxu1 %v486_v4  ;;  %v412_v7 = vld [vmem:[%s1744_s20] sm:$0xf]  ;;  %v413_v8 = vld [vmem:[%s1744_s20 + $0x4] sm:$0xf]  ;;  %v532_v9 = vsel %vm435_vm1, %v418_v5, 0  ;;  %v578_v10 = vsel %vm435_vm1, %v419_v6, 0 }
  0x69   : > { %1152 = vmatprep.subr.bf16.mxu0 %v1535_v0  ;;  %1158 = vmatprep.subr.bf16.mxu1 %v1535_v0  ;;  %v414_v11 = vld [vmem:[%s1744_s20 + $0x8] sm:$0xf]  ;;  %v415_v12 = vld [vmem:[%s1744_s20 + $0xc] sm:$0xf]  ;;  %s410_s10 = scalar_lea.vmem %s1930_s3, %s409_s12  ;;  %v425_v14 = vld [vmem:[#allocation8] sm:$0xff]  ;;  %s1100_s25 = sshll.u32 %s1740_s7, 5 }
  0x6a   : > { %v1102_v13 = vld [vmem:[%s410_s10] ss:$0 sm:$0xff]  ;;  %v1537_v16 = vmov -1e+30   ;;  %v421_v1 = vld [vmem:[%s1755_s11 + $0x4] sm:$0xf] }
  0x6b   : > { %v432_v15 = vmul.f32 %v1102_v13, %v425_v14  ;;  %v420_v62 = vld [vmem:[%s1755_s11] sm:$0xf]  ;;  %v723_v2 = vsel %vm675_vm3, %v421_v1, 0  ;;  %s407_s30 = scalar_lea.vmem [#allocation11], %s1100_s25  ;;  %v423_v13 = vld [vmem:[%s1755_s11 + $0xc] sm:$0xf] }
  0x6c   : > { %v677_v63 = vsel %vm675_vm3, %v420_v62, 0  ;;  %s898_s29 = sshll.u32 %s407_s30, 4  ;;  %s1122_s19 = sshll.u32 %s1519_s24, 9  ;;  %s1830_s29 = int_to_ptr.vmem [resolvable:$true] %s898_s29 }
  0x6d   : > { %vm433_vm2 = vcmp.ne.f32.partialorder %v432_v15, 0.0  ;;  %s1837_s1 = scalar_lea.hbm %s1933_s6, %s1122_s19  ;;  %s867_s26 = scalar_lea.sflag [#allocation12], %s1740_s7 }
  0x6e   : > { %v434_v17 = vsel %vm433_vm2, 0.0, %v1537_v16  ;;  %v815_v16 = vsel %vm675_vm3, %v423_v13, 0  ;;  %s1409_s0 = scalar_lea.vmem %s1830_s29, 512  ;;  %s1538_s8 = smov [#allocation11]  }
  0x6f   : > { %1143 = vmatmul.mubr.msk.bf16.vlgmr.msra.gmra.mxu0 %vm435_vm1, %v412_v7  ;;  %1149 = vmatmul.mubr.msk.bf16.vlgmr.msra.gmra.mxu1 %vm435_vm1, %v413_v8  ;;  %v422_v8 = vld [vmem:[%s1755_s11 + $0x8] sm:$0xf]  ;;  %p1410_p10 = scmp.ne.s32.totalorder %s1830_s29, %s1409_s0  ;;  %s1413_s20 = sshll.u32 %s1538_s8, 4  ;;  %s1414_s20 = int_to_ptr.vmem [resolvable:$false] %s1413_s20 }
  0x70   : > { %1153 = vmatpush3.bf16.xpose.msra.mxu0 %v532_v9  ;;  %1159 = vmatpush3.bf16.xpose.msra.mxu1 %v578_v10  ;;  %s1415_s9 = scalar_lea.vmem %s1414_s20, 1024  ;;  %p1416_p5 = scmp.lt.s32.totalorder %s1830_s29, %s1414_s20 }
  0x71   : > { %1154 = vmatprep.mubr.msk.bf16.mxu0 %vm1536_vm0, %v1535_v0  ;;  %1160 = vmatprep.mubr.msk.bf16.mxu1 %vm1536_vm0, %v1535_v0  ;;  %p1411_p0 = pnand %p1410_p10, %p1673_p12  ;;  %p1417_p1 = scmp.lt.s32.totalorder %s1415_s9, %s1409_s0 }
  0x72   : > { %1164 = vmatprep.subr.bf16.mxu0 %v1535_v0  ;;  %1170 = vmatprep.subr.bf16.mxu1 %v1535_v0 }
  0x73   : > { %p1412_p8 = pneg %p1411_p0  ;;  %p1418_p6 = por %p1417_p1, %p1416_p5 }
  0x75   : > { %p1419_p9 = pnand %p1418_p6, %p1412_p8 }
  0x77   : > { %1155 = vmatmul.mubr.msk.bf16.vlgmr.msra.gmra.mxu0 %vm435_vm1, %v414_v11  ;;  %1161 = vmatmul.mubr.msk.bf16.vlgmr.msra.gmra.mxu1 %vm435_vm1, %v415_v12  ;;  %v769_v11 = vsel %vm675_vm3, %v422_v8, 0 }
  0x78   : > { %1166 = vmatprep.mubr.msk.bf16.mxu0 %vm1536_vm0, %v1535_v0  ;;  %1172 = vmatprep.mubr.msk.bf16.mxu1 %vm1536_vm0, %v1535_v0 }
  0x79   : > { %1165 = vmatpush3.bf16.msra.mxu0 %v677_v63  ;;  %1171 = vmatpush3.bf16.msra.mxu1 %v723_v2 }
  0x7a   : > { %1176 = vmatprep.subr.bf16.mxu0 %v1535_v0  ;;  %1182 = vmatprep.subr.bf16.mxu1 %v1535_v0 }
 0x12f   : > { %v476_v18 = vpop.f32.mrf.mxu0  ;;  %v522_v19 = vpop.f32.mrf.mxu1 }
 0x130   : > { %v477_v20 = vadd.f32 %v476_v18, %v434_v17  ;;  %v523_v21 = vadd.f32 %v522_v19, %v434_v17 }
 0x131   : > { %v1144_v22 = vpop.f32.mrf.mxu0  ;;  %v1150_v23 = vpop.f32.mrf.mxu1 }
 0x132   : > { %v620_v24 = vsel %vm435_vm1, %v477_v20, -inf  ;;  %v623_v27 = vsel %vm435_vm1, %v523_v21, -inf }
 0x133   : > { %v525_v25 = vpop.f32.mrf.mxu1  ;;  %621 = vmax.xlane.f32.xlu0 %v620_v24  ;;  %v479_v26 = vpop.f32.mrf.mxu0 }
 0x135   : > { %v1145_v28 = vpop.f32.mrf.mxu0  ;;  %v1151_v29 = vpop.f32.mrf.mxu1 }
 0x137   : > { %v614_v30 = vpop.f32.mrf.mxu1  ;;  %624 = vmax.xlane.f32.xlu0 %v623_v27  ;;  %v568_v31 = vpop.f32.mrf.mxu0 }
 0x138   : > { %v615_v32 = vadd.f32 %v614_v30, %v434_v17  ;;  %v569_v33 = vadd.f32 %v568_v31, %v434_v17 }
 0x139   : > { %v1156_v34 = vpop.f32.mrf.mxu0  ;;  %v1162_v35 = vpop.f32.mrf.mxu1 }
 0x13a   : > { %v626_v36 = vsel %vm435_vm1, %v569_v33, -inf  ;;  %v629_v39 = vsel %vm435_vm1, %v615_v32, -inf }
 0x13b   : > { %v617_v37 = vpop.f32.mrf.mxu1  ;;  %627 = vmax.xlane.f32.xlu1 %v626_v36  ;;  %v571_v38 = vpop.f32.mrf.mxu0 }
 0x13d   : > { %v1157_v40 = vpop.f32.mrf.mxu0  ;;  %v1163_v41 = vpop.f32.mrf.mxu1 }
 0x13f   : > { %630 = vmax.xlane.f32.xlu1 %v629_v39 }
 0x1bc   : > { %v622_v42 = vpop.xlane.xlu0 %621 }
 0x1bd   : > { %v632_v43 = vsub.f32 %v477_v20, %v622_v42 }
 0x1bf   : > { %v636_v44 = vmul.f32 1.442695, %v632_v43 }
 0x1c0   : > { %v625_v45 = vpop.xlane.xlu0 %624 }
 0x1c1   : > { %1283 = vpow2.f32 %v636_v44  ;;  %v633_v46 = vsub.f32 %v523_v21, %v625_v45 }
 0x1c3   : > { %v638_v47 = vmul.f32 1.442695, %v633_v46 }
 0x1c4   : > { %v628_v48 = vpop.xlane.xlu1 %627 }
 0x1c5   : > { %1285 = vpow2.f32 %v638_v47  ;;  %v634_v49 = vsub.f32 %v569_v33, %v628_v48 }
 0x1c7   : > { %v640_v50 = vmul.f32 1.442695, %v634_v49 }
 0x1c8   : > { %v631_v51 = vpop.xlane.xlu1 %630 }
 0x1c9   : > { %1287 = vpow2.f32 %v640_v50  ;;  %v635_v52 = vsub.f32 %v615_v32, %v631_v51 }
 0x1cb   : > { %v642_v53 = vmul.f32 1.442695, %v635_v52 }
 0x1cd   : > { %1289 = vpow2.f32 %v642_v53 }
 0x1ce   : > { %v1284_v54 = vpop.eup %1283 }
 0x1cf   : > { %v644_v55 = vsel %vm435_vm1, %v1284_v54, 0.0 }
 0x1d0   : > { %645 = vadd.xlane.f32.xlu0 %v644_v55 }
 0x1d2   : > { %v1286_v56 = vpop.eup %1285 }
 0x1d3   : > { %v647_v57 = vsel %vm435_vm1, %v1286_v56, 0.0 }
 0x1d4   : > { %648 = vadd.xlane.f32.xlu1 %v647_v57 }
 0x1d6   : > { %v1288_v58 = vpop.eup %1287 }
 0x1d7   : > { %v650_v59 = vsel %vm435_vm1, %v1288_v58, 0.0 }
 0x1d8   : > { %651 = vadd.xlane.f32.xlu0 %v650_v59 }
 0x1da   : > { %v1290_v60 = vpop.eup %1289 }
 0x1db   : > { %v653_v61 = vsel %vm435_vm1, %v1290_v60, 0.0 }
 0x1dc   : > { %654 = vadd.xlane.f32.xlu1 %v653_v61 }
 0x259   : > { %v646_v3 = vpop.xlane.xlu0 %645 }
 0x25a   : > { %1291 = vrcp.f32 %v646_v3 }
 0x25d   : > { %v649_v4 = vpop.xlane.xlu1 %648 }
 0x25e   : > { %1293 = vrcp.f32 %v649_v4 }
 0x261   : > { %v652_v5 = vpop.xlane.xlu0 %651 }
 0x262   : > { %1295 = vrcp.f32 %v652_v5 }
 0x265   : > { %v655_v6 = vpop.xlane.xlu1 %654 }
 0x266   : > { %1297 = vrcp.f32 %v655_v6 }
 0x267   : > { %v1292_v7 = vpop.eup %1291 }
 0x268   : > { %v660_v9 = vmul.f32 %v1292_v7, %v1284_v54 }
 0x26a   : > { %v668_v10 = vpack.c.bf16 %v660_v9, %v660_v9  ;;  %664 = vst.msk [vmem:[%s407_s30] sm:$0xff] %vm435_vm1, %v660_v9 }
 0x26b   : > { %v1294_v12 = vpop.eup %1293 }
 0x26c   : > { %1167 = vmatmul.mubr.msk.bf16.vlgmr.msra.gmra.mxu0 %vm435_vm1, %v668_v10  ;;  %v661_v14 = vmul.f32 %v1294_v12, %v1286_v56 }
 0x26d   : > { %1177 = vmatpush3.bf16.msra.mxu0 %v769_v11  ;;  %1178 = vmatprep.mubr.msk.bf16.mxu0 %vm1536_vm0, %v1535_v0 }
 0x26e   : > { %v669_v15 = vpack.c.bf16 %v661_v14, %v661_v14  ;;  %665 = vst.msk [vmem:[%s407_s30 + $0x8] sm:$0xff] %vm435_vm1, %v661_v14 }
 0x26f   : > { %v1296_v17 = vpop.eup %1295 }
 0x270   : > { %v662_v18 = vmul.f32 %v1296_v17, %v1288_v58  ;;  %1173 = vmatmul.mubr.msk.bf16.vlgmr.msra.gmra.mxu1 %vm435_vm1, %v669_v15 }
 0x271   : > { %1183 = vmatpush3.bf16.msra.mxu1 %v815_v16  ;;  %1184 = vmatprep.mubr.msk.bf16.mxu1 %vm1536_vm0, %v1535_v0 }
 0x272   : > { %v670_v19 = vpack.c.bf16 %v662_v18, %v662_v18  ;;  %666 = vst.msk [vmem:[%s407_s30 + $0x10] sm:$0xff] %vm435_vm1, %v662_v18 }
 0x273   : > { %v1298_v20 = vpop.eup %1297 }
 0x274   : > { %v663_v21 = vmul.f32 %v1298_v20, %v1290_v60  ;;  %1179 = vmatmul.mubr.msk.bf16.vlgmr.msra.gmra.mxu0 %vm435_vm1, %v670_v19 }
 0x276   : > { %v671_v22 = vpack.c.bf16 %v663_v21, %v663_v21  ;;  %667 = vst.msk [vmem:[%s407_s30 + $0x18] sm:$0xff] %vm435_vm1, %v663_v21 }
 0x278   : > { %1185 = vmatmul.mubr.msk.bf16.vlgmr.msra.gmra.mxu1 %vm435_vm1, %v671_v22 }
 0x279   : > { %1422 = shalt.err (!%p1419_p9)
}
 0x27a   : > { %s1423_s17 = scalar_lea.hbm %s1837_s1, 512  ;;  %s1427_s12 = scalar_lea.hbm %s1933_s6, 1024 }
 0x27b   : > { %p1424_p3 = scmp.ne.s32.totalorder %s1837_s1, %s1423_s17  ;;  %p1428_p7 = scmp.lt.s32.totalorder %s1837_s1, %s1933_s6 }
 0x27c   : > { %p1429_p2 = scmp.lt.s32.totalorder %s1427_s12, %s1423_s17 }
 0x27d   : > { %p1425_p4 = pnand %p1424_p3, %p1673_p12 }
 0x27e   : > { %p1430_p11 = por %p1429_p2, %p1428_p7 }
 0x27f   : > { %p1426_p13 = pneg %p1425_p4 }
 0x281   : > { %p1431_p10 = pnand %p1430_p11, %p1426_p13 }
 0x283   : > { %1434 = shalt.err (!%p1431_p10)
}
 0x284   : > { %s1539_s10 = smov 128   ;;  %s1540_s30 = smov 8  }
 0x285   : > { %1199 = dma.vmem_to_hbm [thread:$0]  (%p1673_p12), %s1830_s29, 512, %s1837_s1, %s867_s26, %s1539_s10, %s1539_s10, %s1540_s30  }
 0x286   : > { %s400_s28 = scalar_lea.vmem [#allocation10], %s1100_s25  ;;  %s1877_s1 = scalar_lea.hbm %s1932_s5, %s1122_s19 }
 0x287   : > { %s881_s27 = sshll.u32 %s400_s28, 4  ;;  %s862_s26 = scalar_lea.sflag [#allocation4], %s1740_s7  ;;  %s1870_s27 = int_to_ptr.vmem [resolvable:$true] %s881_s27 }
 0x288   : > { %s1435_s0 = scalar_lea.vmem %s1870_s27, 512  ;;  %s1541_s8 = smov [#allocation10]  }
 0x289   : > { %p1436_p0 = scmp.ne.s32.totalorder %s1870_s27, %s1435_s0  ;;  %s1439_s24 = sshll.u32 %s1541_s8, 4  ;;  %s1440_s24 = int_to_ptr.vmem [resolvable:$false] %s1439_s24 }
 0x28a   : > { %s1441_s20 = scalar_lea.vmem %s1440_s24, 1024  ;;  %p1442_p1 = scmp.lt.s32.totalorder %s1870_s27, %s1440_s24 }
 0x28b   : > { %p1437_p8 = pnand %p1436_p0, %p1673_p12  ;;  %p1443_p6 = scmp.lt.s32.totalorder %s1441_s20, %s1435_s0 }
 0x28d   : > { %p1438_p5 = pneg %p1437_p8  ;;  %p1444_p9 = por %p1443_p6, %p1442_p1 }
 0x28f   : > { %p1445_p3 = pnand %p1444_p9, %p1438_p5 }
 0x32c   : > { %v713_v0 = vpop.f32.mrf.mxu0 }
 0x32d   : > { %857 = vst.msk [vmem:[%s400_s28] sm:$0xff] %vm435_vm1, %v713_v0 }
 0x32e   : > { %v1168_v23 = vpop.f32.mrf.mxu0 }
 0x330   : > { %v716_v24 = vpop.f32.mrf.mxu0  ;;  %v759_v25 = vpop.f32.mrf.mxu1 }
 0x331   : > { %858 = vst.msk [vmem:[%s400_s28 + $0x8] sm:$0xff] %vm435_vm1, %v759_v25 }
 0x332   : > { %v1169_v26 = vpop.f32.mrf.mxu0  ;;  %v1174_v27 = vpop.f32.mrf.mxu1 }
 0x334   : > { %v762_v28 = vpop.f32.mrf.mxu1  ;;  %v805_v29 = vpop.f32.mrf.mxu0 }
 0x335   : > { %859 = vst.msk [vmem:[%s400_s28 + $0x10] sm:$0xff] %vm435_vm1, %v805_v29 }
 0x336   : > { %v1175_v30 = vpop.f32.mrf.mxu1  ;;  %v1180_v31 = vpop.f32.mrf.mxu0 }
 0x338   : > { %v808_v32 = vpop.f32.mrf.mxu0  ;;  %v851_v33 = vpop.f32.mrf.mxu1 }
 0x339   : > { %860 = vst.msk [vmem:[%s400_s28 + $0x18] sm:$0xff] %vm435_vm1, %v851_v33 }
 0x33a   : > { %v1181_v34 = vpop.f32.mrf.mxu0  ;;  %v1186_v35 = vpop.f32.mrf.mxu1 }
 0x33b   : > { %1448 = shalt.err (!%p1445_p3)
}
 0x33c   : > { %s1449_s19 = scalar_lea.hbm %s1877_s1, 512  ;;  %s1453_s17 = scalar_lea.hbm %s1932_s5, 1024 }
 0x33d   : > { %p1450_p4 = scmp.ne.s32.totalorder %s1877_s1, %s1449_s19  ;;  %p1454_p2 = scmp.lt.s32.totalorder %s1877_s1, %s1932_s5 }
 0x33e   : > { %p1455_p11 = scmp.lt.s32.totalorder %s1453_s17, %s1449_s19 }
 0x33f   : > { %p1451_p13 = pnand %p1450_p4, %p1673_p12 }
 0x340   : > { %p1456_p10 = por %p1455_p11, %p1454_p2 }
 0x341   : > { %p1452_p7 = pneg %p1451_p13 }
 0x343   : > { %p1457_p0 = pnand %p1456_p10, %p1452_p7 }
 0x345   : > { %1460 = shalt.err (!%p1457_p0)
}
 0x346   : > { %1198 = dma.vmem_to_hbm [thread:$0]  (%p1673_p12), %s1870_s27, 512, %s1877_s1, %s862_s26, %s1539_s10, %s1539_s10, %s1540_s30   ;;  %v854_v36 = vpop.f32.mrf.mxu1 }
 0x348   : > { %v1187_v37 = vpop.f32.mrf.mxu1 }
 0x349 PF: > { %s1965_s12 = sld [smem:[#allocation19_spill]]  ;;  %s913_s15 = sand.u32 1, %s1507_s21  }
 0x34a   : > { %p1966_p8 = scmp.ne.s32.totalorder %s1955_s16, 0  ;;  %s914_s13 = scalar_lea.sflag [#allocation4], %s913_s15 }
 0x34f   : > { %p1967_p5 = scmp.ge.s32.totalorder %s1965_s12, 2 }
 0x351   : > { %p1217_p1 = pnand %p1967_p5, %p1966_p8 }
 0x353   : > { %p1218_p6 = pneg %p1217_p1 }
 0x355   : > { %1498 = dma.done.wait (%p1218_p6), %s914_s13, 512  }
 0x356   : > { %1500 = vsyncadd (%p1218_p6), %s914_s13, 4294966784  ;;  %s923_s14 = scalar_lea.sflag [#allocation12], %s913_s15 }
 0x357   : > { %1502 = dma.done.wait (%p1218_p6), %s923_s14, 512  }
 0x358   : > { %1504 = vsyncadd (%p1218_p6), %s923_s14, 4294966784  ;;  %s30_s26 = sadd.s32 1, %s1965_s12   ;;  %s1968_s10 = sld [smem:[#allocation21_spill]] }
 0x359   : > { %p27_p12 = scmp.ge.s32.totalorder %s30_s26, 4   ;;  %s1969_s24 = sld [smem:[#allocation18_spill]] }
 0x35a   : > { %s1970_s25 = sld [smem:[#allocation20_spill]]  ;;  %s1971_s21 = smov %s1511_s22 }
 0x35b   : > { %s1972_s22 = smov %s1515_s23  ;;  %29 = sbr.rel (!%p27_p12) target bundleno = 14 (0xe), region = 134 }
 0x35e   : > { %s1973_s23 = smov %s1968_s10 }
 0x360   :  { %928 = vsyncpa [#allocation3], 1 }
 0x361   :  { %930 = vsyncpa [#allocation3 + $0x1], 1 }
 0x362   :  { %931 = vsyncpa [#allocation6], 1 }
 0x363   :  { %933 = vsyncpa [#allocation6 + $0x1], 1 }
 0x364   :  { %934 = vsyncpa [#allocation9], 1 }
 0x365   :  { %935 = vsyncpa [#allocation4], 1 }
 0x366   :  { %937 = vsyncpa [#allocation4 + $0x1], 1 }
 0x367   :  { %938 = vsyncpa [#allocation12], 1 }
 0x368   :  { %940 = vsyncpa [#allocation12 + $0x1], 1 }

</bundles_post_ra>
